<compile_context>
chip_gen: v7x
topology: tpu7x:2x2x1
jax: 0.10.0
libtpu: 0.0.40
codegen_flags: <defaults>
</compile_context>

<pallas_src>
import functools

import jax
import jax.numpy as jnp
from jax.experimental import pallas as pl
from jax.experimental.pallas import tpu as pltpu


def _round_up(x, m):
    return (x + m - 1) // m * m


# ---------------------------------------------------------------------------
# Pallas kernel: fused matmul + bias + activation (one M row-tile per step)
# ---------------------------------------------------------------------------
def _mm_bias_act_kernel(a_ref, w_ref, b_ref, o_ref, *, act):
    acc = jnp.dot(a_ref[...], w_ref[...], preferred_element_type=jnp.float32)
    acc = acc + b_ref[...]                        # bias broadcast over rows
    if act == "relu":
        acc = jnp.maximum(acc, 0.0)
    elif act == "sigmoid":
        acc = jax.nn.sigmoid(acc)
    o_ref[...] = acc.astype(o_ref.dtype)


def matmul_bias_act(a, w, b, act, *, tm=512):
    """act(a @ w + b).  a:(M,K) f32, w:(K,N) f32, b:(N,) f32 -> (M,N) f32."""
    M, K = a.shape
    N = w.shape[1]

    Kp = _round_up(K, 16)            # bf16 sublane multiple
    Np = _round_up(N, 128)           # lane-dense output -> unmasked stores
    tm = min(tm, _round_up(M, 16))   # row tile (multiple of 16 for bf16 A)
    Mp = _round_up(M, tm)

    # bf16 operands for the MXU; padded regions are zero so results are exact.
    a_p = jnp.pad(a.astype(jnp.bfloat16), ((0, Mp - M), (0, Kp - K)))
    w_p = jnp.pad(w.astype(jnp.bfloat16), ((0, Kp - K), (0, Np - N)))
    b_p = jnp.pad(b.astype(jnp.float32).reshape(1, N), ((0, 0), (0, Np - N)))

    cost = pl.CostEstimate(
        flops=2 * Mp * Kp * Np,
        transcendentals=(Mp * Np) if act == "sigmoid" else 0,
        bytes_accessed=a_p.size * 2 + w_p.size * 2 + b_p.size * 4 + Mp * Np * 4,
    )

    out = pl.pallas_call(
        functools.partial(_mm_bias_act_kernel, act=act),
        out_shape=jax.ShapeDtypeStruct((Mp, Np), jnp.float32),
        grid=(Mp // tm,),
        in_specs=[
            pl.BlockSpec((tm, Kp), lambda i: (i, 0)),   # streamed A row tiles
            pl.BlockSpec((Kp, Np), lambda i: (0, 0)),   # resident weights
            pl.BlockSpec((1, Np), lambda i: (0, 0)),    # resident bias
        ],
        out_specs=pl.BlockSpec((tm, Np), lambda i: (i, 0)),
        compiler_params=pltpu.CompilerParams(
            dimension_semantics=("parallel",)),
        cost_estimate=cost,
    )(a_p, w_p, b_p)
    return out[:M, :N]


# ---------------------------------------------------------------------------
# Plain-JAX glue: im2col patch extraction (pad / strided slices / reshape)
# ---------------------------------------------------------------------------
def _im2col(xp, ksize, stride, out_h, out_w):
    """xp: already-padded NHWC input -> (N*out_h*out_w, ksize*ksize*C)."""
    N, _, _, C = xp.shape
    cols = []
    for i in range(ksize):
        for j in range(ksize):
            patch = xp[:, i:i + stride * out_h:stride,
                          j:j + stride * out_w:stride, :]
            cols.append(patch)
    A = jnp.concatenate(cols, axis=-1)            # (N, out_h, out_w, k*k*C)
    return A.reshape(N * out_h * out_w, ksize * ksize * C)


def conv2d_s2(x_nhwc, w_oihw, bias, act):
    """nn.Conv2d(Cin, Cout, kernel_size=3, stride=2, padding=1) + activation."""
    # TODO(synk): implicit GEMM (halo-tile DMA inside the kernel) would remove
    # the im2col materialization entirely; JAX-side patch extraction kept for
    # robustness, with bf16 A halving its HBM traffic.
    k, s, p = 3, 2, 1
    N, H, W, C = x_nhwc.shape
    Cout = w_oihw.shape[0]
    Ho = (H + 2 * p - k) // s + 1
    Wo = (W + 2 * p - k) // s + 1
    xp = jnp.pad(x_nhwc, ((0, 0), (p, p), (p, p), (0, 0)))
    A = _im2col(xp, k, s, Ho, Wo)                             # (M, 9*Cin)
    Wm = jnp.transpose(w_oihw, (2, 3, 1, 0)).reshape(k * k * C, Cout)
    out = matmul_bias_act(A, Wm, bias, act)
    return out.reshape(N, Ho, Wo, Cout)


# ---------------------------------------------------------------------------
# ConvTranspose2d(s=2, p=1, op=1) via subpixel (output-parity) decomposition
# ---------------------------------------------------------------------------
def _tap(parity, d):
    """Kernel index contributing to output parity `parity` from window offset
    `d` in {0,1}.  None -> no contribution (stays zero in the packed weight)."""
    if parity == 0:
        return 1 if d == 0 else None
    return 2 if d == 0 else 0


def conv_transpose2d_s2(x_nhwc, w_iohw, bias, act):
    """nn.ConvTranspose2d(Cin, Cout, k=3, stride=2, padding=1,
    output_padding=1) + activation.

    out[n, 2i+py, 2j+px, co] = sum_{dy,dx,ci} x_pad[n, i+dy, j+dx, ci]
                               * W[ci, co, tap(py,dy), tap(px,dx)]
    i.e. a 2x2-window stride-1 conv on the *un-dilated* input, with all four
    output parities packed into the matmul N dimension.
    """
    N, H, W, C = x_nhwc.shape
    Cout = w_iohw.shape[1]

    # 2x2 window patches over the input padded by 1 on bottom/right.
    xp = jnp.pad(x_nhwc, ((0, 0), (0, 1), (0, 1), (0, 0)))
    cols = []
    for dy in range(2):
        for dx in range(2):
            cols.append(xp[:, dy:dy + H, dx:dx + W, :])
    A = jnp.concatenate(cols, axis=-1).reshape(N * H * W, 4 * C)  # (M, 4*Cin)

    # Packed weight: rows ordered (dy, dx, ci), cols ordered (py, px, co).
    Wc = jnp.zeros((2, 2, C, 2, 2, Cout), jnp.float32)
    for py in range(2):
        for px in range(2):
            for dy in range(2):
                for dx in range(2):
                    ky = _tap(py, dy)
                    kx = _tap(px, dx)
                    if ky is None or kx is None:
                        continue
                    Wc = Wc.at[dy, dx, :, py, px, :].set(w_iohw[:, :, ky, kx])
    Wc = Wc.reshape(4 * C, 4 * Cout)
    bc = jnp.tile(bias, 4)                        # (py, px, co) ordering

    out = matmul_bias_act(A, Wc, bc, act)         # (N*H*W, 4*Cout)
    out = out.reshape(N, H, W, 2, 2, Cout).transpose(0, 1, 3, 2, 4, 5)
    return out.reshape(N, 2 * H, 2 * W, Cout)


# ---------------------------------------------------------------------------
# Model: parameter init + forward
# ---------------------------------------------------------------------------
def init_params(key):
    def conv_w(key, cout, cin, k=3):
        fan_in = cin * k * k
        bound = 1.0 / jnp.sqrt(fan_in)
        kw, kb = jax.random.split(key)
        w = jax.random.uniform(kw, (cout, cin, k, k), jnp.float32, -bound, bound)
        b = jax.random.uniform(kb, (cout,), jnp.float32, -bound, bound)
        return w, b

    def convt_w(key, cin, cout, k=3):
        fan_in = cout * k * k   # PyTorch ConvTranspose2d: weight.size(1)*k*k
        bound = 1.0 / jnp.sqrt(fan_in)
        kw, kb = jax.random.split(key)
        w = jax.random.uniform(kw, (cin, cout, k, k), jnp.float32, -bound, bound)
        b = jax.random.uniform(kb, (cout,), jnp.float32, -bound, bound)
        return w, b

    keys = jax.random.split(key, 6)
    return {
        "enc1": conv_w(keys[0], 16, 3),
        "enc2": conv_w(keys[1], 32, 16),
        "enc3": conv_w(keys[2], 64, 32),
        "dec1": convt_w(keys[3], 64, 32),
        "dec2": convt_w(keys[4], 32, 16),
        "dec3": convt_w(keys[5], 16, 3),
    }


def conv_autoencoder_forward(params, x_nchw):
    # NCHW -> NHWC once at entry
    x = jnp.transpose(x_nchw, (0, 2, 3, 1)).astype(jnp.float32)
    # encoder
    x = conv2d_s2(x, *params["enc1"], act="relu")
    x = conv2d_s2(x, *params["enc2"], act="relu")
    x = conv2d_s2(x, *params["enc3"], act="relu")
    # decoder
    x = conv_transpose2d_s2(x, *params["dec1"], act="relu")
    x = conv_transpose2d_s2(x, *params["dec2"], act="relu")
    x = conv_transpose2d_s2(x, *params["dec3"], act="sigmoid")
    # NHWC -> NCHW once at exit
    return jnp.transpose(x, (0, 3, 1, 2))


if __name__ == "__main__":
    key = jax.random.PRNGKey(0)
    k_param, k_input = jax.random.split(key)
    params = init_params(k_param)

    # small NCHW input consistent with the module (RGB images)
    x = jax.random.uniform(k_input, (2, 3, 16, 16), jnp.float32)

    out = jax.jit(conv_autoencoder_forward)(params, x)
    out = jax.block_until_ready(out)

    assert out.shape == (2, 3, 16, 16), out.shape
    assert bool(jnp.all(jnp.isfinite(out)))
    assert bool(jnp.all((out >= 0.0) & (out <= 1.0)))  # sigmoid output range
    print("KERNEL_OK")
</pallas_src>

<mosaic_0001>
module attributes {stable_mosaic.version = 11 : i64} {
  func.func @_mm_bias_act_kernel(%arg0: i32, %arg1: memref<128x32xbf16, #tpu.memory_space<vmem>>, %arg2: memref<32x128xbf16, #tpu.memory_space<vmem>>, %arg3: memref<1x128xf32, #tpu.memory_space<vmem>>, %arg4: memref<128x128xf32, #tpu.memory_space<vmem>>) attributes {dimension_semantics = [#tpu.dimension_semantics<parallel>], iteration_bounds = array<i64: 1>, scalar_prefetch = 0 : i64, scratch_operands = 0 : i64, tpu.core_type = #tpu.core_type<tc>, window_params = [{transform_indices = @transform_0, window_bounds = array<i64: 128, 32>}, {pipeline_mode = #tpu.pipeline_mode<synchronous>, transform_indices = @transform_1, window_bounds = array<i64: 32, 128>}, {pipeline_mode = #tpu.pipeline_mode<synchronous>, transform_indices = @transform_2, window_bounds = array<i64: 1, 128>}, {transform_indices = @transform_3, window_bounds = array<i64: 128, 128>}]} {
    %c0 = arith.constant 0 : index
    %c0_0 = arith.constant 0 : index
    %0 = vector.load %arg1[%c0, %c0_0] : memref<128x32xbf16, #tpu.memory_space<vmem>>, vector<128x32xbf16>
    %c0_1 = arith.constant 0 : index
    %c0_2 = arith.constant 0 : index
    %1 = vector.load %arg2[%c0_1, %c0_2] : memref<32x128xbf16, #tpu.memory_space<vmem>>, vector<32x128xbf16>
    %cst = arith.constant dense<0.000000e+00> : vector<128x128xf32>
    %2 = tpu.matmul %0, %1, %cst {dimension_numbers = #tpu.dot_dimension_numbers<[1], [0], [0], [1], [0, 0, 1, 1], [], []>} : vector<128x32xbf16>, vector<32x128xbf16>, vector<128x128xf32> -> vector<128x128xf32>
    %c0_3 = arith.constant 0 : index
    %c0_4 = arith.constant 0 : index
    %3 = vector.load %arg3[%c0_3, %c0_4] : memref<1x128xf32, #tpu.memory_space<vmem>>, vector<1x128xf32>
    %4 = vector.broadcast %3 : vector<1x128xf32> to vector<128x128xf32>
    %5 = arith.addf %2, %4 : vector<128x128xf32>
    %cst_5 = arith.constant 0.000000e+00 : f32
    %6 = vector.broadcast %cst_5 : f32 to vector<128x128xf32>
    %7 = arith.maximumf %5, %6 : vector<128x128xf32>
    %c0_6 = arith.constant 0 : index
    %c0_7 = arith.constant 0 : index
    %8 = vector.load %arg4[%c0_6, %c0_7] : memref<128x128xf32, #tpu.memory_space<vmem>>, vector<128x128xf32>
    tpu.vector_store %arg4[%c0_6, %c0_7], %7 {strides = array<i32>} : memref<128x128xf32, #tpu.memory_space<vmem>>, vector<128x128xf32>,
    return
  }
  func.func @transform_0(%arg0: i32) -> (i32, i32) {
    %c0_i32 = arith.constant 0 : i32
    %c0_i32_0 = arith.constant 0 : i32
    return %arg0, %c0_i32 : i32, i32
  }
  func.func @transform_1(%arg0: i32) -> (i32, i32) {
    %c0_i32 = arith.constant 0 : i32
    %c0_i32_0 = arith.constant 0 : i32
    %c0_i32_1 = arith.constant 0 : i32
    return %c0_i32, %c0_i32_0 : i32, i32
  }
  func.func @transform_2(%arg0: i32) -> (i32, i32) {
    %c0_i32 = arith.constant 0 : i32
    %c0_i32_0 = arith.constant 0 : i32
    %c0_i32_1 = arith.constant 0 : i32
    return %c0_i32, %c0_i32_0 : i32, i32
  }
  func.func @transform_3(%arg0: i32) -> (i32, i32) {
    %c0_i32 = arith.constant 0 : i32
    %c0_i32_0 = arith.constant 0 : i32
    return %arg0, %c0_i32 : i32, i32
  }
}

module attributes {stable_mosaic.version = 11 : i64} {
  func.func @_mm_bias_act_kernel(%arg0: i32, %arg1: memref<32x144xbf16, #tpu.memory_space<vmem>>, %arg2: memref<144x128xbf16, #tpu.memory_space<vmem>>, %arg3: memref<1x128xf32, #tpu.memory_space<vmem>>, %arg4: memref<32x128xf32, #tpu.memory_space<vmem>>) attributes {dimension_semantics = [#tpu.dimension_semantics<parallel>], iteration_bounds = array<i64: 1>, scalar_prefetch = 0 : i64, scratch_operands = 0 : i64, tpu.core_type = #tpu.core_type<tc>, window_params = [{transform_indices = @transform_0, window_bounds = array<i64: 32, 144>}, {pipeline_mode = #tpu.pipeline_mode<synchronous>, transform_indices = @transform_1, window_bounds = array<i64: 144, 128>}, {pipeline_mode = #tpu.pipeline_mode<synchronous>, transform_indices = @transform_2, window_bounds = array<i64: 1, 128>}, {transform_indices = @transform_3, window_bounds = array<i64: 32, 128>}]} {
    %c0 = arith.constant 0 : index
    %c0_0 = arith.constant 0 : index
    %0 = vector.load %arg1[%c0, %c0_0] : memref<32x144xbf16, #tpu.memory_space<vmem>>, vector<32x144xbf16>
    %c0_1 = arith.constant 0 : index
    %c0_2 = arith.constant 0 : index
    %1 = vector.load %arg2[%c0_1, %c0_2] : memref<144x128xbf16, #tpu.memory_space<vmem>>, vector<144x128xbf16>
    %cst = arith.constant dense<0.000000e+00> : vector<32x128xf32>
    %2 = tpu.matmul %0, %1, %cst {dimension_numbers = #tpu.dot_dimension_numbers<[1], [0], [0], [1], [0, 0, 1, 1], [], []>} : vector<32x144xbf16>, vector<144x128xbf16>, vector<32x128xf32> -> vector<32x128xf32>
    %c0_3 = arith.constant 0 : index
    %c0_4 = arith.constant 0 : index
    %3 = vector.load %arg3[%c0_3, %c0_4] : memref<1x128xf32, #tpu.memory_space<vmem>>, vector<1x128xf32>
    %4 = vector.broadcast %3 : vector<1x128xf32> to vector<32x128xf32>
    %5 = arith.addf %2, %4 : vector<32x128xf32>
    %cst_5 = arith.constant 0.000000e+00 : f32
    %6 = vector.broadcast %cst_5 : f32 to vector<32x128xf32>
    %7 = arith.maximumf %5, %6 : vector<32x128xf32>
    %c0_6 = arith.constant 0 : index
    %c0_7 = arith.constant 0 : index
    %8 = vector.load %arg4[%c0_6, %c0_7] : memref<32x128xf32, #tpu.memory_space<vmem>>, vector<32x128xf32>
    tpu.vector_store %arg4[%c0_6, %c0_7], %7 {strides = array<i32>} : memref<32x128xf32, #tpu.memory_space<vmem>>, vector<32x128xf32>,
    return
  }
  func.func @transform_0(%arg0: i32) -> (i32, i32) {
    %c0_i32 = arith.constant 0 : i32
    %c0_i32_0 = arith.constant 0 : i32
    return %arg0, %c0_i32 : i32, i32
  }
  func.func @transform_1(%arg0: i32) -> (i32, i32) {
    %c0_i32 = arith.constant 0 : i32
    %c0_i32_0 = arith.constant 0 : i32
    %c0_i32_1 = arith.constant 0 : i32
    return %c0_i32, %c0_i32_0 : i32, i32
  }
  func.func @transform_2(%arg0: i32) -> (i32, i32) {
    %c0_i32 = arith.constant 0 : i32
    %c0_i32_0 = arith.constant 0 : i32
    %c0_i32_1 = arith.constant 0 : i32
    return %c0_i32, %c0_i32_0 : i32, i32
  }
  func.func @transform_3(%arg0: i32) -> (i32, i32) {
    %c0_i32 = arith.constant 0 : i32
    %c0_i32_0 = arith.constant 0 : i32
    return %arg0, %c0_i32 : i32, i32
  }
}

module attributes {stable_mosaic.version = 11 : i64} {
  func.func @_mm_bias_act_kernel(%arg0: i32, %arg1: memref<16x288xbf16, #tpu.memory_space<vmem>>, %arg2: memref<288x128xbf16, #tpu.memory_space<vmem>>, %arg3: memref<1x128xf32, #tpu.memory_space<vmem>>, %arg4: memref<16x128xf32, #tpu.memory_space<vmem>>) attributes {dimension_semantics = [#tpu.dimension_semantics<parallel>], iteration_bounds = array<i64: 1>, scalar_prefetch = 0 : i64, scratch_operands = 0 : i64, tpu.core_type = #tpu.core_type<tc>, window_params = [{transform_indices = @transform_0, window_bounds = array<i64: 16, 288>}, {pipeline_mode = #tpu.pipeline_mode<synchronous>, transform_indices = @transform_1, window_bounds = array<i64: 288, 128>}, {pipeline_mode = #tpu.pipeline_mode<synchronous>, transform_indices = @transform_2, window_bounds = array<i64: 1, 128>}, {transform_indices = @transform_3, window_bounds = array<i64: 16, 128>}]} {
    %c0 = arith.constant 0 : index
    %c0_0 = arith.constant 0 : index
    %0 = vector.load %arg1[%c0, %c0_0] : memref<16x288xbf16, #tpu.memory_space<vmem>>, vector<16x288xbf16>
    %c0_1 = arith.constant 0 : index
    %c0_2 = arith.constant 0 : index
    %1 = vector.load %arg2[%c0_1, %c0_2] : memref<288x128xbf16, #tpu.memory_space<vmem>>, vector<288x128xbf16>
    %cst = arith.constant dense<0.000000e+00> : vector<16x128xf32>
    %2 = tpu.matmul %0, %1, %cst {dimension_numbers = #tpu.dot_dimension_numbers<[1], [0], [0], [1], [0, 0, 1, 1], [], []>} : vector<16x288xbf16>, vector<288x128xbf16>, vector<16x128xf32> -> vector<16x128xf32>
    %c0_3 = arith.constant 0 : index
    %c0_4 = arith.constant 0 : index
    %3 = vector.load %arg3[%c0_3, %c0_4] : memref<1x128xf32, #tpu.memory_space<vmem>>, vector<1x128xf32>
    %4 = vector.broadcast %3 : vector<1x128xf32> to vector<16x128xf32>
    %5 = arith.addf %2, %4 : vector<16x128xf32>
    %cst_5 = arith.constant 0.000000e+00 : f32
    %6 = vector.broadcast %cst_5 : f32 to vector<16x128xf32>
    %7 = arith.maximumf %5, %6 : vector<16x128xf32>
    %c0_6 = arith.constant 0 : index
    %c0_7 = arith.constant 0 : index
    %8 = vector.load %arg4[%c0_6, %c0_7] : memref<16x128xf32, #tpu.memory_space<vmem>>, vector<16x128xf32>
    tpu.vector_store %arg4[%c0_6, %c0_7], %7 {strides = array<i32>} : memref<16x128xf32, #tpu.memory_space<vmem>>, vector<16x128xf32>,
    return
  }
  func.func @transform_0(%arg0: i32) -> (i32, i32) {
    %c0_i32 = arith.constant 0 : i32
    %c0_i32_0 = arith.constant 0 : i32
    return %arg0, %c0_i32 : i32, i32
  }
  func.func @transform_1(%arg0: i32) -> (i32, i32) {
    %c0_i32 = arith.constant 0 : i32
    %c0_i32_0 = arith.constant 0 : i32
    %c0_i32_1 = arith.constant 0 : i32
    return %c0_i32, %c0_i32_0 : i32, i32
  }
  func.func @transform_2(%arg0: i32) -> (i32, i32) {
    %c0_i32 = arith.constant 0 : i32
    %c0_i32_0 = arith.constant 0 : i32
    %c0_i32_1 = arith.constant 0 : i32
    return %c0_i32, %c0_i32_0 : i32, i32
  }
  func.func @transform_3(%arg0: i32) -> (i32, i32) {
    %c0_i32 = arith.constant 0 : i32
    %c0_i32_0 = arith.constant 0 : i32
    return %arg0, %c0_i32 : i32, i32
  }
}

module attributes {stable_mosaic.version = 11 : i64} {
  func.func @_mm_bias_act_kernel(%arg0: i32, %arg1: memref<16x256xbf16, #tpu.memory_space<vmem>>, %arg2: memref<256x128xbf16, #tpu.memory_space<vmem>>, %arg3: memref<1x128xf32, #tpu.memory_space<vmem>>, %arg4: memref<16x128xf32, #tpu.memory_space<vmem>>) attributes {dimension_semantics = [#tpu.dimension_semantics<parallel>], iteration_bounds = array<i64: 1>, scalar_prefetch = 0 : i64, scratch_operands = 0 : i64, tpu.core_type = #tpu.core_type<tc>, window_params = [{transform_indices = @transform_0, window_bounds = array<i64: 16, 256>}, {pipeline_mode = #tpu.pipeline_mode<synchronous>, transform_indices = @transform_1, window_bounds = array<i64: 256, 128>}, {pipeline_mode = #tpu.pipeline_mode<synchronous>, transform_indices = @transform_2, window_bounds = array<i64: 1, 128>}, {transform_indices = @transform_3, window_bounds = array<i64: 16, 128>}]} {
    %c0 = arith.constant 0 : index
    %c0_0 = arith.constant 0 : index
    %0 = vector.load %arg1[%c0, %c0_0] : memref<16x256xbf16, #tpu.memory_space<vmem>>, vector<16x256xbf16>
    %c0_1 = arith.constant 0 : index
    %c0_2 = arith.constant 0 : index
    %1 = vector.load %arg2[%c0_1, %c0_2] : memref<256x128xbf16, #tpu.memory_space<vmem>>, vector<256x128xbf16>
    %cst = arith.constant dense<0.000000e+00> : vector<16x128xf32>
    %2 = tpu.matmul %0, %1, %cst {dimension_numbers = #tpu.dot_dimension_numbers<[1], [0], [0], [1], [0, 0, 1, 1], [], []>} : vector<16x256xbf16>, vector<256x128xbf16>, vector<16x128xf32> -> vector<16x128xf32>
    %c0_3 = arith.constant 0 : index
    %c0_4 = arith.constant 0 : index
    %3 = vector.load %arg3[%c0_3, %c0_4] : memref<1x128xf32, #tpu.memory_space<vmem>>, vector<1x128xf32>
    %4 = vector.broadcast %3 : vector<1x128xf32> to vector<16x128xf32>
    %5 = arith.addf %2, %4 : vector<16x128xf32>
    %cst_5 = arith.constant 0.000000e+00 : f32
    %6 = vector.broadcast %cst_5 : f32 to vector<16x128xf32>
    %7 = arith.maximumf %5, %6 : vector<16x128xf32>
    %c0_6 = arith.constant 0 : index
    %c0_7 = arith.constant 0 : index
    %8 = vector.load %arg4[%c0_6, %c0_7] : memref<16x128xf32, #tpu.memory_space<vmem>>, vector<16x128xf32>
    tpu.vector_store %arg4[%c0_6, %c0_7], %7 {strides = array<i32>} : memref<16x128xf32, #tpu.memory_space<vmem>>, vector<16x128xf32>,
    return
  }
  func.func @transform_0(%arg0: i32) -> (i32, i32) {
    %c0_i32 = arith.constant 0 : i32
    %c0_i32_0 = arith.constant 0 : i32
    return %arg0, %c0_i32 : i32, i32
  }
  func.func @transform_1(%arg0: i32) -> (i32, i32) {
    %c0_i32 = arith.constant 0 : i32
    %c0_i32_0 = arith.constant 0 : i32
    %c0_i32_1 = arith.constant 0 : i32
    return %c0_i32, %c0_i32_0 : i32, i32
  }
  func.func @transform_2(%arg0: i32) -> (i32, i32) {
    %c0_i32 = arith.constant 0 : i32
    %c0_i32_0 = arith.constant 0 : i32
    %c0_i32_1 = arith.constant 0 : i32
    return %c0_i32, %c0_i32_0 : i32, i32
  }
  func.func @transform_3(%arg0: i32) -> (i32, i32) {
    %c0_i32 = arith.constant 0 : i32
    %c0_i32_0 = arith.constant 0 : i32
    return %arg0, %c0_i32 : i32, i32
  }
}

module attributes {stable_mosaic.version = 11 : i64} {
  func.func @_mm_bias_act_kernel(%arg0: i32, %arg1: memref<32x128xbf16, #tpu.memory_space<vmem>>, %arg2: memref<128x128xbf16, #tpu.memory_space<vmem>>, %arg3: memref<1x128xf32, #tpu.memory_space<vmem>>, %arg4: memref<32x128xf32, #tpu.memory_space<vmem>>) attributes {dimension_semantics = [#tpu.dimension_semantics<parallel>], iteration_bounds = array<i64: 1>, scalar_prefetch = 0 : i64, scratch_operands = 0 : i64, tpu.core_type = #tpu.core_type<tc>, window_params = [{transform_indices = @transform_0, window_bounds = array<i64: 32, 128>}, {pipeline_mode = #tpu.pipeline_mode<synchronous>, transform_indices = @transform_1, window_bounds = array<i64: 128, 128>}, {pipeline_mode = #tpu.pipeline_mode<synchronous>, transform_indices = @transform_2, window_bounds = array<i64: 1, 128>}, {transform_indices = @transform_3, window_bounds = array<i64: 32, 128>}]} {
    %c0 = arith.constant 0 : index
    %c0_0 = arith.constant 0 : index
    %0 = vector.load %arg1[%c0, %c0_0] : memref<32x128xbf16, #tpu.memory_space<vmem>>, vector<32x128xbf16>
    %c0_1 = arith.constant 0 : index
    %c0_2 = arith.constant 0 : index
    %1 = vector.load %arg2[%c0_1, %c0_2] : memref<128x128xbf16, #tpu.memory_space<vmem>>, vector<128x128xbf16>
    %cst = arith.constant dense<0.000000e+00> : vector<32x128xf32>
    %2 = tpu.matmul %0, %1, %cst {dimension_numbers = #tpu.dot_dimension_numbers<[1], [0], [0], [1], [0, 0, 1, 1], [], []>} : vector<32x128xbf16>, vector<128x128xbf16>, vector<32x128xf32> -> vector<32x128xf32>
    %c0_3 = arith.constant 0 : index
    %c0_4 = arith.constant 0 : index
    %3 = vector.load %arg3[%c0_3, %c0_4] : memref<1x128xf32, #tpu.memory_space<vmem>>, vector<1x128xf32>
    %4 = vector.broadcast %3 : vector<1x128xf32> to vector<32x128xf32>
    %5 = arith.addf %2, %4 : vector<32x128xf32>
    %cst_5 = arith.constant 0.000000e+00 : f32
    %6 = vector.broadcast %cst_5 : f32 to vector<32x128xf32>
    %7 = arith.maximumf %5, %6 : vector<32x128xf32>
    %c0_6 = arith.constant 0 : index
    %c0_7 = arith.constant 0 : index
    %8 = vector.load %arg4[%c0_6, %c0_7] : memref<32x128xf32, #tpu.memory_space<vmem>>, vector<32x128xf32>
    tpu.vector_store %arg4[%c0_6, %c0_7], %7 {strides = array<i32>} : memref<32x128xf32, #tpu.memory_space<vmem>>, vector<32x128xf32>,
    return
  }
  func.func @transform_0(%arg0: i32) -> (i32, i32) {
    %c0_i32 = arith.constant 0 : i32
    %c0_i32_0 = arith.constant 0 : i32
    return %arg0, %c0_i32 : i32, i32
  }
  func.func @transform_1(%arg0: i32) -> (i32, i32) {
    %c0_i32 = arith.constant 0 : i32
    %c0_i32_0 = arith.constant 0 : i32
    %c0_i32_1 = arith.constant 0 : i32
    return %c0_i32, %c0_i32_0 : i32, i32
  }
  func.func @transform_2(%arg0: i32) -> (i32, i32) {
    %c0_i32 = arith.constant 0 : i32
    %c0_i32_0 = arith.constant 0 : i32
    %c0_i32_1 = arith.constant 0 : i32
    return %c0_i32, %c0_i32_0 : i32, i32
  }
  func.func @transform_3(%arg0: i32) -> (i32, i32) {
    %c0_i32 = arith.constant 0 : i32
    %c0_i32_0 = arith.constant 0 : i32
    return %arg0, %c0_i32 : i32, i32
  }
}

module attributes {stable_mosaic.version = 11 : i64} {
  func.func @_mm_bias_act_kernel(%arg0: i32, %arg1: memref<128x64xbf16, #tpu.memory_space<vmem>>, %arg2: memref<64x128xbf16, #tpu.memory_space<vmem>>, %arg3: memref<1x128xf32, #tpu.memory_space<vmem>>, %arg4: memref<128x128xf32, #tpu.memory_space<vmem>>) attributes {dimension_semantics = [#tpu.dimension_semantics<parallel>], iteration_bounds = array<i64: 1>, scalar_prefetch = 0 : i64, scratch_operands = 0 : i64, tpu.core_type = #tpu.core_type<tc>, window_params = [{transform_indices = @transform_0, window_bounds = array<i64: 128, 64>}, {pipeline_mode = #tpu.pipeline_mode<synchronous>, transform_indices = @transform_1, window_bounds = array<i64: 64, 128>}, {pipeline_mode = #tpu.pipeline_mode<synchronous>, transform_indices = @transform_2, window_bounds = array<i64: 1, 128>}, {transform_indices = @transform_3, window_bounds = array<i64: 128, 128>}]} {
    %c0 = arith.constant 0 : index
    %c0_0 = arith.constant 0 : index
    %0 = vector.load %arg1[%c0, %c0_0] : memref<128x64xbf16, #tpu.memory_space<vmem>>, vector<128x64xbf16>
    %c0_1 = arith.constant 0 : index
    %c0_2 = arith.constant 0 : index
    %1 = vector.load %arg2[%c0_1, %c0_2] : memref<64x128xbf16, #tpu.memory_space<vmem>>, vector<64x128xbf16>
    %cst = arith.constant dense<0.000000e+00> : vector<128x128xf32>
    %2 = tpu.matmul %0, %1, %cst {dimension_numbers = #tpu.dot_dimension_numbers<[1], [0], [0], [1], [0, 0, 1, 1], [], []>} : vector<128x64xbf16>, vector<64x128xbf16>, vector<128x128xf32> -> vector<128x128xf32>
    %c0_3 = arith.constant 0 : index
    %c0_4 = arith.constant 0 : index
    %3 = vector.load %arg3[%c0_3, %c0_4] : memref<1x128xf32, #tpu.memory_space<vmem>>, vector<1x128xf32>
    %4 = vector.broadcast %3 : vector<1x128xf32> to vector<128x128xf32>
    %5 = arith.addf %2, %4 : vector<128x128xf32>
    %6 = arith.negf %5 : vector<128x128xf32>
    %7 = math.exp %6 : vector<128x128xf32>
    %cst_5 = arith.constant 1.000000e+00 : f32
    %8 = vector.broadcast %cst_5 : f32 to vector<128x128xf32>
    %9 = arith.addf %8, %7 : vector<128x128xf32>
    %10 = arith.divf %8, %9 : vector<128x128xf32>
    %c0_6 = arith.constant 0 : index
    %c0_7 = arith.constant 0 : index
    %11 = vector.load %arg4[%c0_6, %c0_7] : memref<128x128xf32, #tpu.memory_space<vmem>>, vector<128x128xf32>
    tpu.vector_store %arg4[%c0_6, %c0_7], %10 {strides = array<i32>} : memref<128x128xf32, #tpu.memory_space<vmem>>, vector<128x128xf32>,
    return
  }
  func.func @transform_0(%arg0: i32) -> (i32, i32) {
    %c0_i32 = arith.constant 0 : i32
    %c0_i32_0 = arith.constant 0 : i32
    return %arg0, %c0_i32 : i32, i32
  }
  func.func @transform_1(%arg0: i32) -> (i32, i32) {
    %c0_i32 = arith.constant 0 : i32
    %c0_i32_0 = arith.constant 0 : i32
    %c0_i32_1 = arith.constant 0 : i32
    return %c0_i32, %c0_i32_0 : i32, i32
  }
  func.func @transform_2(%arg0: i32) -> (i32, i32) {
    %c0_i32 = arith.constant 0 : i32
    %c0_i32_0 = arith.constant 0 : i32
    %c0_i32_1 = arith.constant 0 : i32
    return %c0_i32, %c0_i32_0 : i32, i32
  }
  func.func @transform_3(%arg0: i32) -> (i32, i32) {
    %c0_i32 = arith.constant 0 : i32
    %c0_i32_0 = arith.constant 0 : i32
    return %arg0, %c0_i32 : i32, i32
  }
}

</mosaic_0001>

<bundles_post_ra>
// kernel: conv_autoencoder_forward.6
= control target key start
LH: loop header
LB: loop body
LE: loop exit
PB: predicated region body
PF: predicated region fallthrough
CT: control target
= control target key end

     0   :  { %vm94_vm0 = vcmask 261120   ;;  %s424_s1 = inlined_call_operand.vmem [shape: bf16[32,128], index: 1, kind: input, shape index: {}]   ;;  %s425_s0 = inlined_call_operand.vmem [shape: bf16[128,32], index: 0, kind: input, shape index: {}]   ;;  %s426_s2 = inlined_call_operand.vmem [shape: f32[1,128], index: 2, kind: input, shape index: {}]   ;;  %s427_s3 = inlined_call_operand.vmem [shape: f32[128,128], index: 3, kind: output, shape index: {}]  }
   0x1   :  { %v305_v0 = vld [vmem:[%s424_s1] sm:$0xff]   ;;  %v306_v1 = vld [vmem:[%s424_s1 + $0x8] sm:$0xff]   ;;  %v311_v6 = vld [vmem:[%s425_s0 + $0x10] sm:$0xff]  }
   0x2   :  { %281 = vmatprep.subr.bf16.mxu0 %v305_v0  ;;  %301 = vmatprep.subr.bf16.mxu1 %v305_v0  ;;  %v307_v2 = vld [vmem:[%s425_s0] sm:$0xff]   ;;  %v309_v4 = vld [vmem:[%s425_s0 + $0x8] sm:$0xff]   ;;  %v312_v7 = vld [vmem:[%s425_s0 + $0x30] sm:$0xff]  }
   0x3   :  { %282 = vmatpush3.bf16.msra.mxu0 %v305_v0  ;;  %303 = vmatpush3.bf16.msra.mxu1 %v305_v0  ;;  %v308_v3 = vld [vmem:[%s425_s0 + $0x20] sm:$0xff]   ;;  %v310_v5 = vld [vmem:[%s425_s0 + $0x28] sm:$0xff]   ;;  %v313_v8 = vld [vmem:[%s425_s0 + $0x18] sm:$0xff]  }
   0x4   :  { %283 = vmatprep.subr.bf16.mxu0 %v306_v1  ;;  %302 = vmatprep.subr.bf16.mxu1 %v306_v1  ;;  %v314_v9 = vld [vmem:[%s425_s0 + $0x38] sm:$0xff]   ;;  %v252_v10 = vld [vmem:[%s426_s2] ss:$0 sm:$0xff] }
   0x5   :  { %285 = vmatprep.mubr.msk.bf16.mxu0 %vm94_vm0, %v307_v2  ;;  %293 = vmatprep.mubr.msk.bf16.mxu1 %vm94_vm0, %v308_v3 }
   0x7   :  { %284 = vmatpush3.bf16.msra.mxu0 %v306_v1  ;;  %304 = vmatpush3.bf16.msra.mxu1 %v306_v1 }
   0xa   :  { %286 = vmatmul.mubr.msk.bf16.vlgmr.msra.gmra.mrb[0].mxu0 %vm94_vm0, %v309_v4  ;;  %294 = vmatmul.mubr.msk.bf16.vlgmr.msra.gmra.mrb[0].mxu1 %vm94_vm0, %v310_v5 }
   0xb   :  { %289 = vmatprep.mubr.msk.bf16.mxu0 %vm94_vm0, %v311_v6  ;;  %297 = vmatprep.mubr.msk.bf16.mxu1 %vm94_vm0, %v312_v7 }
  0x12   :  { %290 = vmatmul.mubr.msk.bf16.gmra.mrb[4].mxu0 %vm94_vm0, %v313_v8  ;;  %298 = vmatmul.mubr.msk.bf16.gmra.mrb[4].mxu1 %vm94_vm0, %v314_v9 }
  0xdd   :  { %v287_v11 = vpop.f32.mrb[0].mxu0  ;;  %v295_v12 = vpop.f32.mrb[0].mxu1 }
  0xde   :  { %v162_v13 = vadd.f32 %v287_v11, %v252_v10  ;;  %v194_v14 = vadd.f32 %v295_v12, %v252_v10  ;;  %v153_v15 = vpop.f32.mrb[1].mxu0  ;;  %v185_v16 = vpop.f32.mrb[1].mxu1 }
  0xdf   :  { %v154_v17 = vadd.f32 %v252_v10, %v153_v15  ;;  %v186_v18 = vadd.f32 %v252_v10, %v185_v16  ;;  %v288_v19 = vpop.f32.mrb[2].mxu0  ;;  %v296_v20 = vpop.f32.mrb[2].mxu1 }
  0xe0   :  { %v218_v21 = vmax.f32 %v162_v13, 0.0  ;;  %v226_v22 = vmax.f32 %v194_v14, 0.0  ;;  %v165_v23 = vadd.f32 %v288_v19, %v252_v10  ;;  %v197_v24 = vadd.f32 %v296_v20, %v252_v10  ;;  %v156_v25 = vpop.f32.mrb[3].mxu0  ;;  %v188_v26 = vpop.f32.mrb[3].mxu1 }
  0xe1   :  { %v216_v27 = vmax.f32 %v154_v17, 0.0  ;;  %v224_v28 = vmax.f32 %v186_v18, 0.0  ;;  %v157_v29 = vadd.f32 %v252_v10, %v156_v25  ;;  %v189_v30 = vadd.f32 %v252_v10, %v188_v26 }
  0xe2   :  { %234 = vst [vmem:[%s427_s3 + $0x10] sm:$0xff] %v218_v21  ;;  %242 = vst [vmem:[%s427_s3 + $0x50] sm:$0xff] %v226_v22  ;;  %v219_v31 = vmax.f32 %v165_v23, 0.0  ;;  %v227_v32 = vmax.f32 %v197_v24, 0.0 }
  0xe3   :  { %232 = vst [vmem:[%s427_s3] sm:$0xff] %v216_v27  ;;  %240 = vst [vmem:[%s427_s3 + $0x40] sm:$0xff] %v224_v28  ;;  %v217_v33 = vmax.f32 %v157_v29, 0.0  ;;  %v225_v34 = vmax.f32 %v189_v30, 0.0 }
  0xe4   :  { %235 = vst [vmem:[%s427_s3 + $0x18] sm:$0xff] %v219_v31  ;;  %243 = vst [vmem:[%s427_s3 + $0x58] sm:$0xff] %v227_v32 }
  0xe5   :  { %233 = vst [vmem:[%s427_s3 + $0x8] sm:$0xff] %v217_v33  ;;  %241 = vst [vmem:[%s427_s3 + $0x48] sm:$0xff] %v225_v34  ;;  %v291_v35 = vpop.f32.mrb[4].mxu0  ;;  %v299_v36 = vpop.f32.mrb[4].mxu1 }
  0xe6   :  { %v178_v37 = vadd.f32 %v291_v35, %v252_v10  ;;  %v210_v38 = vadd.f32 %v299_v36, %v252_v10  ;;  %v169_v39 = vpop.f32.mrb[5].mxu0  ;;  %v201_v40 = vpop.f32.mrb[5].mxu1 }
  0xe7   :  { %v170_v41 = vadd.f32 %v252_v10, %v169_v39  ;;  %v202_v42 = vadd.f32 %v252_v10, %v201_v40  ;;  %v292_v43 = vpop.f32.mrb[6].mxu0  ;;  %v300_v44 = vpop.f32.mrb[6].mxu1 }
  0xe8   :  { %v222_v45 = vmax.f32 %v178_v37, 0.0  ;;  %v230_v46 = vmax.f32 %v210_v38, 0.0  ;;  %v181_v47 = vadd.f32 %v292_v43, %v252_v10  ;;  %v213_v48 = vadd.f32 %v300_v44, %v252_v10  ;;  %v172_v49 = vpop.f32.mrb[7].mxu0  ;;  %v204_v50 = vpop.f32.mrb[7].mxu1 }
  0xe9   :  { %v220_v51 = vmax.f32 %v170_v41, 0.0  ;;  %v228_v52 = vmax.f32 %v202_v42, 0.0  ;;  %v173_v53 = vadd.f32 %v252_v10, %v172_v49  ;;  %v205_v54 = vadd.f32 %v252_v10, %v204_v50 }
  0xea   :  { %238 = vst [vmem:[%s427_s3 + $0x30] sm:$0xff] %v222_v45  ;;  %246 = vst [vmem:[%s427_s3 + $0x70] sm:$0xff] %v230_v46  ;;  %v223_v55 = vmax.f32 %v181_v47, 0.0  ;;  %v231_v56 = vmax.f32 %v213_v48, 0.0 }
  0xeb   :  { %236 = vst [vmem:[%s427_s3 + $0x20] sm:$0xff] %v220_v51  ;;  %244 = vst [vmem:[%s427_s3 + $0x60] sm:$0xff] %v228_v52  ;;  %v221_v57 = vmax.f32 %v173_v53, 0.0  ;;  %v229_v58 = vmax.f32 %v205_v54, 0.0 }
  0xec   :  { %239 = vst [vmem:[%s427_s3 + $0x38] sm:$0xff] %v223_v55  ;;  %247 = vst [vmem:[%s427_s3 + $0x78] sm:$0xff] %v231_v56 }
  0xed   :  { %237 = vst [vmem:[%s427_s3 + $0x28] sm:$0xff] %v221_v57  ;;  %245 = vst [vmem:[%s427_s3 + $0x68] sm:$0xff] %v229_v58 }

// kernel: conv_autoencoder_forward.7
= control target key start
LH: loop header
LB: loop body
LE: loop exit
PB: predicated region body
PF: predicated region fallthrough
CT: control target
= control target key end

     0   :  { %v234_v0 = vmov 0   ;;  %vm116_vm0 = vcmask 130048   ;;  %s309_s1 = inlined_call_operand.vmem [shape: bf16[144,128], index: 1, kind: input, shape index: {}]   ;;  %s310_s0 = inlined_call_operand.vmem [shape: bf16[32,144], index: 0, kind: input, shape index: {}]   ;;  %s311_s2 = inlined_call_operand.vmem [shape: f32[1,128], index: 2, kind: input, shape index: {}]   ;;  %s312_s3 = inlined_call_operand.vmem [shape: f32[32,128], index: 3, kind: output, shape index: {}]  }
   0x1   :  { %123 = vmatprep.subr.bf16.mxu0 %v234_v0  ;;  %200 = vmatprep.subr.bf16.mxu1 %v234_v0  ;;  %v219_v1 = vld [vmem:[%s309_s1] sm:$0xff]   ;;  %v220_v2 = vld [vmem:[%s309_s1 + $0x8] sm:$0xff]   ;;  %v221_v3 = vld [vmem:[%s309_s1 + $0x10] sm:$0xff]  }
   0x2   :  { %124 = vmatpush1.bf16.msra.mxu0 %v219_v1  ;;  %209 = vmatpush1.bf16.msra.mxu1 %v219_v1  ;;  %v222_v4 = vld [vmem:[%s309_s1 + $0x18] sm:$0xff]   ;;  %v230_v5 = vld [vmem:[%s310_s0 + $0x4] ss:$8 sps:$4 sm:$0xff]   ;;  %v225_v9 = vld [vmem:[%s309_s1 + $0x30] sm:$0xff]  }
   0x3   :  { %125 = vmatprep.subr.bf16.mxu0 %v234_v0  ;;  %201 = vmatprep.subr.bf16.mxu1 %v234_v0  ;;  %v233_v6 = vld [vmem:[%s310_s0 + $0x14] ss:$8 sps:$4 sm:$0xff]   ;;  %v223_v7 = vld [vmem:[%s309_s1 + $0x20] sm:$0xff]   ;;  %v224_v8 = vld [vmem:[%s309_s1 + $0x28] sm:$0xff]  }
   0x4   :  { %198 = vmatprep.mubr.msk.bf16.mxu0 %vm116_vm0, %v230_v5  ;;  %199 = vmatprep.mubr.msk.bf16.mxu1 %vm116_vm0, %v233_v6  ;;  %v226_v10 = vld [vmem:[%s309_s1 + $0x38] sm:$0xff]   ;;  %v227_v11 = vld [vmem:[%s309_s1 + $0x40] sm:$0xff]  }
   0x5   :  { %v228_v12 = vld [vmem:[%s310_s0] ss:$8 sps:$4 sm:$0xff]   ;;  %v231_v13 = vld [vmem:[%s310_s0 + $0x10] ss:$8 sps:$4 sm:$0xff]  }
   0x6   :  { %126 = vmatpush1.bf16.msra.mxu0 %v220_v2  ;;  %210 = vmatpush1.bf16.msra.mxu1 %v220_v2  ;;  %v184_v14 = vld [vmem:[%s311_s2] ss:$0 sm:$0xff] }
   0x7   :  { %127 = vmatprep.subr.bf16.mxu0 %v234_v0  ;;  %202 = vmatprep.subr.bf16.mxu1 %v234_v0 }
   0xa   :  { %128 = vmatpush1.bf16.msra.mxu0 %v221_v3  ;;  %211 = vmatpush1.bf16.msra.mxu1 %v221_v3 }
   0xb   :  { %129 = vmatprep.subr.bf16.mxu0 %v234_v0  ;;  %203 = vmatprep.subr.bf16.mxu1 %v234_v0 }
   0xe   :  { %130 = vmatpush1.bf16.msra.mxu0 %v222_v4  ;;  %212 = vmatpush1.bf16.msra.mxu1 %v222_v4 }
   0xf   :  { %131 = vmatprep.subr.bf16.mxu0 %v234_v0  ;;  %204 = vmatprep.subr.bf16.mxu1 %v234_v0 }
  0x12   :  { %132 = vmatpush1.bf16.msra.mxu0 %v223_v7  ;;  %213 = vmatpush1.bf16.msra.mxu1 %v223_v7 }
  0x13   :  { %133 = vmatprep.subr.bf16.mxu0 %v234_v0  ;;  %205 = vmatprep.subr.bf16.mxu1 %v234_v0 }
  0x16   :  { %134 = vmatpush1.bf16.msra.mxu0 %v224_v8  ;;  %214 = vmatpush1.bf16.msra.mxu1 %v224_v8 }
  0x17   :  { %135 = vmatprep.subr.bf16.mxu0 %v234_v0  ;;  %206 = vmatprep.subr.bf16.mxu1 %v234_v0 }
  0x1a   :  { %136 = vmatpush1.bf16.msra.mxu0 %v225_v9  ;;  %215 = vmatpush1.bf16.msra.mxu1 %v225_v9 }
  0x1b   :  { %137 = vmatprep.subr.bf16.mxu0 %v234_v0  ;;  %207 = vmatprep.subr.bf16.mxu1 %v234_v0 }
  0x1e   :  { %138 = vmatpush1.bf16.msra.mxu0 %v226_v10  ;;  %216 = vmatpush1.bf16.msra.mxu1 %v226_v10 }
  0x1f   :  { %139 = vmatprep.subr.bf16.mxu0 %v234_v0  ;;  %208 = vmatprep.subr.bf16.mxu1 %v234_v0 }
  0x22   :  { %140 = vmatpush1.bf16.msra.mxu0 %v227_v11  ;;  %217 = vmatpush1.bf16.msra.mxu1 %v227_v11 }
  0x25   :  { %156 = vmatmul.mubr.bf16.vlgmr.msra.gmra.mrb[0].mxu0 %v228_v12  ;;  %164 = vmatmul.mubr.bf16.vlgmr.msra.gmra.mrb[0].mxu1 %v231_v13 }
  0xf8   :  { %v157_v15 = vpop.f32.mrb[0].mxu0  ;;  %v165_v16 = vpop.f32.mrb[0].mxu1 }
  0xf9   :  { %v158_v17 = vadd.f32 %v184_v14, %v157_v15  ;;  %v166_v18 = vadd.f32 %v184_v14, %v165_v16  ;;  %v159_v19 = vpop.f32.mrb[1].mxu0  ;;  %v167_v20 = vpop.f32.mrb[1].mxu1 }
  0xfa   :  { %v160_v21 = vpop.f32.mrb[2].mxu0  ;;  %v168_v22 = vpop.f32.mrb[2].mxu1 }
  0xfb   :  { %v172_v23 = vmax.f32 %v158_v17, 0.0  ;;  %v174_v24 = vmax.f32 %v166_v18, 0.0  ;;  %v161_v25 = vadd.f32 %v184_v14, %v160_v21  ;;  %v169_v26 = vadd.f32 %v184_v14, %v168_v22  ;;  %v162_v27 = vpop.f32.mrb[3].mxu0  ;;  %v170_v28 = vpop.f32.mrb[3].mxu1 }
  0xfd   :  { %176 = vst [vmem:[%s312_s3] sm:$0xff] %v172_v23  ;;  %178 = vst [vmem:[%s312_s3 + $0x10] sm:$0xff] %v174_v24  ;;  %v173_v29 = vmax.f32 %v161_v25, 0.0  ;;  %v175_v30 = vmax.f32 %v169_v26, 0.0 }
  0xff   :  { %177 = vst [vmem:[%s312_s3 + $0x8] sm:$0xff] %v173_v29  ;;  %179 = vst [vmem:[%s312_s3 + $0x18] sm:$0xff] %v175_v30 }

// kernel: conv_autoencoder_forward.8
= control target key start
LH: loop header
LB: loop body
LE: loop exit
PB: predicated region body
PF: predicated region fallthrough
CT: control target
= control target key end

     0   :  { %v359_v1 = vmov 0.0   ;;  %vm360_vm0 = vmmov 0   ;;  %vm185_vm1 = vcmask 261120   ;;  %s453_s1 = inlined_call_operand.vmem [shape: bf16[288,128], index: 1, kind: input, shape index: {}]   ;;  %s454_s0 = inlined_call_operand.vmem [shape: bf16[16,288], index: 0, kind: input, shape index: {}]   ;;  %s455_s2 = inlined_call_operand.vmem [shape: f32[1,128], index: 2, kind: input, shape index: {}]   ;;  %s456_s3 = inlined_call_operand.vmem [shape: f32[16,128], index: 3, kind: output, shape index: {}]  }
   0x1   :  { %v337_v0 = vld [vmem:[%s453_s1 + $0x40] sm:$0xff]   ;;  %327 = vmatprep.subr.bf16.mxu1 %v359_v1  ;;  %331 = vmatprep.mubr.msk.bf16.mxu1 %vm360_vm0, %v359_v1  ;;  %v339_v3 = vld [vmem:[%s453_s1 + $0x48] sm:$0xff]   ;;  %v341_v5 = vld [vmem:[%s453_s1 + $0x50] sm:$0xff]  }
   0x2   :  { %v338_v2 = vld [vmem:[%s453_s1] sm:$0xff]   ;;  %302 = vmatprep.subr.bf16.mxu0 %v337_v0  ;;  %v340_v4 = vld [vmem:[%s453_s1 + $0x8] sm:$0xff]   ;;  %v342_v6 = vld [vmem:[%s453_s1 + $0x10] sm:$0xff]  }
   0x3   :  { %303 = vmatpush3.bf16.msra.mxu0 %v338_v2  ;;  %v343_v7 = vld [vmem:[%s453_s1 + $0x58] sm:$0xff]   ;;  %v345_v9 = vld [vmem:[%s453_s1 + $0x60] sm:$0xff]   ;;  %v347_v12 = vld [vmem:[%s453_s1 + $0x68] sm:$0xff]  }
   0x4   :  { %304 = vmatprep.subr.bf16.mxu0 %v339_v3  ;;  %v344_v8 = vld [vmem:[%s453_s1 + $0x18] sm:$0xff]   ;;  %v351_v10 = vld [vmem:[%s453_s1 + $0x80] sm:$0xff]   ;;  %v348_v13 = vld [vmem:[%s453_s1 + $0x28] sm:$0xff]  }
   0x5   :  { %v346_v11 = vld [vmem:[%s453_s1 + $0x20] sm:$0xff]   ;;  %328 = vmatpush3.bf16.msra.mxu1 %v351_v10  ;;  %v357_v15 = vld [vmem:[%s453_s1 + $0x88] sm:$0xff]   ;;  %v349_v16 = vld [vmem:[%s453_s1 + $0x70] sm:$0xff]  }
   0x6   :  { %329 = vmatprep.subr.bf16.mxu1 %v359_v1  ;;  %v356_v14 = vld [vmem:[%s454_s0 + $0x4] ss:$12 sps:$4 sm:$0xff]   ;;  %v358_v17 = vld [vmem:[%s454_s0 + $0x8] ss:$12 sps:$4 sm:$0xff]   ;;  %v352_v19 = vld [vmem:[%s453_s1 + $0x78] sm:$0xff]  }
   0x7   :  { %305 = vmatpush3.bf16.msra.mxu0 %v340_v4  ;;  %221 = vmatprep.mubr.bf16.mxu0 %v356_v14  ;;  %v350_v18 = vld [vmem:[%s453_s1 + $0x30] sm:$0xff]   ;;  %v353_v20 = vld [vmem:[%s453_s1 + $0x38] sm:$0xff]   ;;  %v354_v21 = vld [vmem:[%s454_s0] ss:$12 sps:$4 sm:$0xff]  }
   0x8   :  { %306 = vmatprep.subr.bf16.mxu0 %v341_v5  ;;  %v279_v28 = vld [vmem:[%s455_s2] ss:$0 sm:$0xff] }
   0x9   :  { %330 = vmatpush3.bf16.msra.mxu1 %v357_v15 }
   0xb   :  { %307 = vmatpush3.bf16.msra.mxu0 %v342_v6 }
   0xc   :  { %308 = vmatprep.subr.bf16.mxu0 %v343_v7  ;;  %332 = vmatmul.mubr.msk.bf16.vlgmr.msra.gmra.mrb[0].mxu1 %vm185_vm1, %v358_v17 }
   0xf   :  { %309 = vmatpush3.bf16.msra.mxu0 %v344_v8 }
  0x10   :  { %310 = vmatprep.subr.bf16.mxu0 %v345_v9 }
  0x13   :  { %311 = vmatpush3.bf16.msra.mxu0 %v346_v11 }
  0x14   :  { %312 = vmatprep.subr.bf16.mxu0 %v347_v12 }
  0x17   :  { %313 = vmatpush3.bf16.msra.mxu0 %v348_v13 }
  0x18   :  { %314 = vmatprep.subr.bf16.mxu0 %v349_v16 }
  0x1b   :  { %315 = vmatpush3.bf16.msra.mxu0 %v350_v18 }
  0x1c   :  { %316 = vmatprep.subr.bf16.mxu0 %v352_v19 }
  0x1f   :  { %317 = vmatpush3.bf16.msra.mxu0 %v353_v20 }
  0x22   :  { %222 = vmatmul.mubr.bf16.vlgmr.msra.gmra.mrb[0].mxu0 %v354_v21 }
  0xdf   :  { %v264_v22 = vpop.f32.mrb[0].mxu1 }
  0xe0   :  { %v333_v23 = vpop.f32.mrb[1].mxu1 }
  0xe1   :  { %v267_v24 = vpop.f32.mrb[2].mxu1 }
  0xe2   :  { %v334_v25 = vpop.f32.mrb[3].mxu1 }
  0xf5   :  { %v318_v26 = vpop.f32.mrb[0].mxu0 }
  0xf6   :  { %v319_v27 = vpop.f32.mrb[1].mxu0 }
  0xf7   :  { %v320_v29 = vadd.f32 %v319_v27, %v318_v26  ;;  %v321_v30 = vpop.f32.mrb[2].mxu0 }
  0xf8   :  { %v322_v31 = vpop.f32.mrb[3].mxu0 }
  0xf9   :  { %v224_v32 = vadd.f32 %v320_v29, %v279_v28  ;;  %v323_v33 = vadd.f32 %v322_v31, %v321_v30 }
  0xfb   :  { %v265_v34 = vadd.f32 %v264_v22, %v224_v32  ;;  %v227_v35 = vadd.f32 %v323_v33, %v279_v28 }
  0xfd   :  { %v271_v36 = vmax.f32 %v265_v34, 0.0  ;;  %v268_v37 = vadd.f32 %v267_v24, %v227_v35 }
  0xff   :  { %273 = vst [vmem:[%s456_s3] sm:$0xff] %v271_v36  ;;  %v272_v38 = vmax.f32 %v268_v37, 0.0 }
 0x101   :  { %274 = vst [vmem:[%s456_s3 + $0x8] sm:$0xff] %v272_v38 }

// kernel: tile.18
= control target key start
LH: loop header
LB: loop body
LE: loop exit
PB: predicated region body
PF: predicated region fallthrough
CT: control target
= control target key end

     0   :  { %s22_s0 = inlined_call_operand.vmem [shape: f32[32], index: 0, kind: input, shape index: {}]   ;;  %s23_s1 = inlined_call_operand.vmem [shape: f32[4,32], index: 1, kind: output, shape index: {}]  }
   0x1   :  { %v4_v0 = vld [vmem:[%s22_s0] ss:$0 sm:$0xff] }
   0x2   :  { %5 = vst [vmem:[%s23_s1] sm:$0xf] %v4_v0 }

// kernel: tile.19
= control target key start
LH: loop header
LB: loop body
LE: loop exit
PB: predicated region body
PF: predicated region fallthrough
CT: control target
= control target key end

     0   :  { %vm7_vm0 = vcmask 261120   ;;  %s37_s8 = smov 32   ;;  %s38_s9 = smov 64   ;;  %vm13_vm1 = vcmask 1048320   ;;  %vm19_vm2 = vcmask 785920   ;;  %vm25_vm3 = vcmask 523520   ;;  %s55_s0 = inlined_call_operand.vmem [shape: f32[4,32], index: 0, kind: input, shape index: {}]   ;;  %s56_s1 = inlined_call_operand.vmem [shape: f32[1,128], index: 1, kind: output, shape index: {}]  }
   0x1   :  { %v4_v0 = vld [vmem:[%s55_s0] sm:$0xf]  ;;  %s36_s0 = smov 96  }
   0x2   :  { %5 = vst [vmem:[#allocation1] sm:$0xf] %v4_v0 }
   0x9   :  { %v10_v1 = vld [vmem:[#allocation1 + $0x3] sm:$0x1]   ;;  %v22_v2 = vld [vmem:[#allocation1 + $0x1] sm:$0x1]   ;;  %v6_v3 = vld [vmem:[#allocation1] sm:$0x1]  }
   0xa   :  { %11 = vrot.lane.b32.xlu0 %v10_v1, %s36_s0  ;;  %23 = vrot.lane.b32.xlu1 %v22_v2, %s37_s8  ;;  %v16_v4 = vld [vmem:[#allocation1 + $0x2] sm:$0x1]   ;;  %8 = vst.msk [vmem:[#allocation0] sm:$0x1] %vm7_vm0, %v6_v3  }
   0xe   :  { %17 = vrot.lane.b32.xlu0 %v16_v4, %s38_s9 }
  0x7c   :  { %v12_v5 = vpop.permute.xlu0 %11   ;;  %v24_v6 = vpop.permute.xlu1 %23  }
  0x7d   :  { %14 = vst.msk [vmem:[#allocation0] sm:$0x1] %vm13_vm1, %v12_v5  }
  0x80   :  { %v18_v7 = vpop.permute.xlu0 %17  }
  0x81   :  { %20 = vst.msk [vmem:[#allocation0] sm:$0x1] %vm19_vm2, %v18_v7  }
  0x82   :  { %26 = vst.msk [vmem:[#allocation0] sm:$0x1] %vm25_vm3, %v24_v6  }
  0x89   :  { %v30_v8 = vld [vmem:[#allocation0] sm:$0x1] }
  0x8a   :  { %32 = vst [vmem:[%s56_s1] sm:$0x1] %v30_v8 }

// kernel: conv_autoencoder_forward.9
= control target key start
LH: loop header
LB: loop body
LE: loop exit
PB: predicated region body
PF: predicated region fallthrough
CT: control target
= control target key end

     0   :  { %s354_s1 = inlined_call_operand.vmem [shape: bf16[256,128], index: 1, kind: input, shape index: {}]   ;;  %s355_s0 = inlined_call_operand.vmem [shape: bf16[16,256], index: 0, kind: input, shape index: {}]   ;;  %s356_s2 = inlined_call_operand.vmem [shape: f32[1,128], index: 2, kind: input, shape index: {}]   ;;  %s357_s3 = inlined_call_operand.vmem [shape: f32[16,128], index: 3, kind: output, shape index: {}]  }
   0x1   :  { %v252_v0 = vld [vmem:[%s354_s1 + $0x40] sm:$0xff]   ;;  %v254_v2 = vld [vmem:[%s354_s1 + $0x48] sm:$0xff]   ;;  %v256_v4 = vld [vmem:[%s354_s1 + $0x50] sm:$0xff]  }
   0x2   :  { %v253_v1 = vld [vmem:[%s354_s1] sm:$0xff]   ;;  %230 = vmatprep.subr.bf16.mxu0 %v252_v0  ;;  %v255_v3 = vld [vmem:[%s354_s1 + $0x8] sm:$0xff]   ;;  %v257_v5 = vld [vmem:[%s354_s1 + $0x10] sm:$0xff]  }
   0x3   :  { %231 = vmatpush3.bf16.msra.mxu0 %v253_v1  ;;  %v258_v6 = vld [vmem:[%s354_s1 + $0x58] sm:$0xff]   ;;  %v260_v8 = vld [vmem:[%s354_s1 + $0x60] sm:$0xff]   ;;  %v262_v10 = vld [vmem:[%s354_s1 + $0x68] sm:$0xff]  }
   0x4   :  { %232 = vmatprep.subr.bf16.mxu0 %v254_v2  ;;  %v259_v7 = vld [vmem:[%s354_s1 + $0x18] sm:$0xff]   ;;  %v261_v9 = vld [vmem:[%s354_s1 + $0x20] sm:$0xff]   ;;  %v263_v12 = vld [vmem:[%s354_s1 + $0x28] sm:$0xff]  }
   0x5   :  { %v270_v11 = vld [vmem:[%s355_s0 + $0x4] ss:$8 sps:$4 sm:$0xff]   ;;  %v264_v13 = vld [vmem:[%s354_s1 + $0x70] sm:$0xff]   ;;  %v266_v15 = vld [vmem:[%s354_s1 + $0x78] sm:$0xff]  }
   0x6   :  { %194 = vmatprep.mubr.bf16.mxu0 %v270_v11  ;;  %v265_v14 = vld [vmem:[%s354_s1 + $0x30] sm:$0xff]   ;;  %v267_v16 = vld [vmem:[%s354_s1 + $0x38] sm:$0xff]   ;;  %v268_v17 = vld [vmem:[%s355_s0] ss:$8 sps:$4 sm:$0xff]  }
   0x7   :  { %233 = vmatpush3.bf16.msra.mxu0 %v255_v3  ;;  %v211_v19 = vld [vmem:[%s356_s2] ss:$0 sm:$0xff] }
   0x8   :  { %234 = vmatprep.subr.bf16.mxu0 %v256_v4 }
   0xb   :  { %235 = vmatpush3.bf16.msra.mxu0 %v257_v5 }
   0xc   :  { %236 = vmatprep.subr.bf16.mxu0 %v258_v6 }
   0xf   :  { %237 = vmatpush3.bf16.msra.mxu0 %v259_v7 }
  0x10   :  { %238 = vmatprep.subr.bf16.mxu0 %v260_v8 }
  0x13   :  { %239 = vmatpush3.bf16.msra.mxu0 %v261_v9 }
  0x14   :  { %240 = vmatprep.subr.bf16.mxu0 %v262_v10 }
  0x17   :  { %241 = vmatpush3.bf16.msra.mxu0 %v263_v12 }
  0x18   :  { %242 = vmatprep.subr.bf16.mxu0 %v264_v13 }
  0x1b   :  { %243 = vmatpush3.bf16.msra.mxu0 %v265_v14 }
  0x1c   :  { %244 = vmatprep.subr.bf16.mxu0 %v266_v15 }
  0x1f   :  { %245 = vmatpush3.bf16.msra.mxu0 %v267_v16 }
  0x22   :  { %195 = vmatmul.mubr.bf16.vlgmr.msra.gmra.mrb[0].mxu0 %v268_v17 }
  0xf5   :  { %v246_v18 = vpop.f32.mrb[0].mxu0 }
  0xf6   :  { %v247_v20 = vpop.f32.mrb[1].mxu0 }
  0xf7   :  { %v248_v21 = vadd.f32 %v247_v20, %v246_v18  ;;  %v249_v22 = vpop.f32.mrb[2].mxu0 }
  0xf8   :  { %v250_v23 = vpop.f32.mrb[3].mxu0 }
  0xf9   :  { %v197_v24 = vadd.f32 %v248_v21, %v211_v19  ;;  %v251_v25 = vadd.f32 %v250_v23, %v249_v22 }
  0xfb   :  { %v203_v26 = vmax.f32 %v197_v24, 0.0  ;;  %v200_v27 = vadd.f32 %v251_v25, %v211_v19 }
  0xfd   :  { %205 = vst [vmem:[%s357_s3] sm:$0xff] %v203_v26  ;;  %v204_v28 = vmax.f32 %v200_v27, 0.0 }
  0xff   :  { %206 = vst [vmem:[%s357_s3 + $0x8] sm:$0xff] %v204_v28 }

// kernel: tile.23
= control target key start
LH: loop header
LB: loop body
LE: loop exit
PB: predicated region body
PF: predicated region fallthrough
CT: control target
= control target key end

     0   :  { %s22_s0 = inlined_call_operand.vmem [shape: f32[16], index: 0, kind: input, shape index: {}]   ;;  %s23_s1 = inlined_call_operand.vmem [shape: f32[4,16], index: 1, kind: output, shape index: {}]  }
   0x1   :  { %v4_v0 = vld [vmem:[%s22_s0] ss:$0 sm:$0xff] }
   0x2   :  { %5 = vst [vmem:[%s23_s1] sm:$0xf] %v4_v0 }

// kernel: tile.24
= control target key start
LH: loop header
LB: loop body
LE: loop exit
PB: predicated region body
PF: predicated region fallthrough
CT: control target
= control target key end

     0   :  { %vm7_vm0 = vcmask 130048   ;;  %s37_s8 = smov 16   ;;  %s38_s9 = smov 32   ;;  %vm13_vm1 = vcmask 523648   ;;  %vm19_vm2 = vcmask 392448   ;;  %vm25_vm3 = vcmask 261248   ;;  %s55_s0 = inlined_call_operand.vmem [shape: f32[4,16], index: 0, kind: input, shape index: {}]   ;;  %s56_s1 = inlined_call_operand.vmem [shape: f32[1,64], index: 1, kind: output, shape index: {}]  }
   0x1   :  { %v4_v0 = vld [vmem:[%s55_s0] sm:$0xf]  ;;  %s36_s0 = smov 48  }
   0x2   :  { %5 = vst [vmem:[#allocation1] sm:$0xf] %v4_v0 }
   0x9   :  { %v10_v1 = vld [vmem:[#allocation1 + $0x3] sm:$0x1]   ;;  %v22_v2 = vld [vmem:[#allocation1 + $0x1] sm:$0x1]   ;;  %v6_v3 = vld [vmem:[#allocation1] sm:$0x1]  }
   0xa   :  { %11 = vrot.lane.b32.xlu0 %v10_v1, %s36_s0  ;;  %23 = vrot.lane.b32.xlu1 %v22_v2, %s37_s8  ;;  %v16_v4 = vld [vmem:[#allocation1 + $0x2] sm:$0x1]   ;;  %8 = vst.msk [vmem:[#allocation0] sm:$0x1] %vm7_vm0, %v6_v3  }
   0xe   :  { %17 = vrot.lane.b32.xlu0 %v16_v4, %s38_s9 }
  0x7c   :  { %v12_v5 = vpop.permute.xlu0 %11   ;;  %v24_v6 = vpop.permute.xlu1 %23  }
  0x7d   :  { %14 = vst.msk [vmem:[#allocation0] sm:$0x1] %vm13_vm1, %v12_v5  }
  0x80   :  { %v18_v7 = vpop.permute.xlu0 %17  }
  0x81   :  { %20 = vst.msk [vmem:[#allocation0] sm:$0x1] %vm19_vm2, %v18_v7  }
  0x82   :  { %26 = vst.msk [vmem:[#allocation0] sm:$0x1] %vm25_vm3, %v24_v6  }
  0x89   :  { %v30_v8 = vld [vmem:[#allocation0] sm:$0x1] }
  0x8a   :  { %32 = vst [vmem:[%s56_s1] sm:$0x1] %v30_v8 }

// kernel: conv_autoencoder_forward.10
= control target key start
LH: loop header
LB: loop body
LE: loop exit
PB: predicated region body
PF: predicated region fallthrough
CT: control target
= control target key end

     0   :  { %s279_s1 = inlined_call_operand.vmem [shape: bf16[128,128], index: 1, kind: input, shape index: {}]   ;;  %s280_s0 = inlined_call_operand.vmem [shape: bf16[32,128], index: 0, kind: input, shape index: {}]   ;;  %s281_s2 = inlined_call_operand.vmem [shape: f32[1,128], index: 2, kind: input, shape index: {}]   ;;  %s282_s3 = inlined_call_operand.vmem [shape: f32[32,128], index: 3, kind: output, shape index: {}]  }
   0x1   :  { %v204_v0 = vld [vmem:[%s279_s1] sm:$0xff]   ;;  %v205_v1 = vld [vmem:[%s279_s1 + $0x8] sm:$0xff]   ;;  %v206_v2 = vld [vmem:[%s279_s1 + $0x10] sm:$0xff]  }
   0x2   :  { %184 = vmatprep.subr.bf16.mxu0 %v204_v0  ;;  %v207_v3 = vld [vmem:[%s279_s1 + $0x18] sm:$0xff]   ;;  %v212_v4 = vld [vmem:[%s280_s0] sm:$0xff]   ;;  %v209_v6 = vld [vmem:[%s279_s1 + $0x28] sm:$0xff]  }
   0x3   :  { %185 = vmatpush3.bf16.msra.mxu0 %v204_v0  ;;  %200 = vmatprep.mubr.bf16.mxu0 %v212_v4  ;;  %v208_v5 = vld [vmem:[%s279_s1 + $0x20] sm:$0xff]   ;;  %v210_v7 = vld [vmem:[%s279_s1 + $0x30] sm:$0xff]   ;;  %v211_v8 = vld [vmem:[%s279_s1 + $0x38] sm:$0xff]  }
   0x4   :  { %186 = vmatprep.subr.bf16.mxu0 %v205_v1  ;;  %v213_v9 = vld [vmem:[%s280_s0 + $0x8] sm:$0xff]   ;;  %v163_v10 = vld [vmem:[%s281_s2] ss:$0 sm:$0xff] }
   0x7   :  { %187 = vmatpush3.bf16.msra.mxu0 %v205_v1 }
   0x8   :  { %188 = vmatprep.subr.bf16.mxu0 %v206_v2 }
   0xb   :  { %189 = vmatpush3.bf16.msra.mxu0 %v206_v2 }
   0xc   :  { %190 = vmatprep.subr.bf16.mxu0 %v207_v3 }
   0xf   :  { %191 = vmatpush3.bf16.msra.mxu0 %v207_v3 }
  0x10   :  { %192 = vmatprep.subr.bf16.mxu0 %v208_v5 }
  0x13   :  { %193 = vmatpush3.bf16.msra.mxu0 %v208_v5 }
  0x14   :  { %194 = vmatprep.subr.bf16.mxu0 %v209_v6 }
  0x17   :  { %195 = vmatpush3.bf16.msra.mxu0 %v209_v6 }
  0x18   :  { %196 = vmatprep.subr.bf16.mxu0 %v210_v7 }
  0x1b   :  { %197 = vmatpush3.bf16.msra.mxu0 %v210_v7 }
  0x1c   :  { %198 = vmatprep.subr.bf16.mxu0 %v211_v8 }
  0x1f   :  { %199 = vmatpush3.bf16.msra.mxu0 %v211_v8 }
  0x22   :  { %201 = vmatmul.mubr.bf16.vlgmr.msra.gmra.mrb[0].mxu0 %v213_v9 }
  0xf5   :  { %v202_v11 = vpop.f32.mrb[0].mxu0 }
  0xf6   :  { %v145_v12 = vadd.f32 %v202_v11, %v163_v10  ;;  %v136_v13 = vpop.f32.mrb[1].mxu0 }
  0xf7   :  { %v137_v14 = vadd.f32 %v163_v10, %v136_v13  ;;  %v203_v15 = vpop.f32.mrb[2].mxu0 }
  0xf8   :  { %v153_v16 = vmax.f32 %v145_v12, 0.0  ;;  %v148_v17 = vadd.f32 %v203_v15, %v163_v10  ;;  %v139_v18 = vpop.f32.mrb[3].mxu0 }
  0xf9   :  { %v151_v19 = vmax.f32 %v137_v14, 0.0  ;;  %v140_v20 = vadd.f32 %v163_v10, %v139_v18 }
  0xfa   :  { %157 = vst [vmem:[%s282_s3 + $0x10] sm:$0xff] %v153_v16  ;;  %v154_v21 = vmax.f32 %v148_v17, 0.0 }
  0xfb   :  { %155 = vst [vmem:[%s282_s3] sm:$0xff] %v151_v19  ;;  %v152_v22 = vmax.f32 %v140_v20, 0.0 }
  0xfc   :  { %158 = vst [vmem:[%s282_s3 + $0x18] sm:$0xff] %v154_v21 }
  0xfd   :  { %156 = vst [vmem:[%s282_s3 + $0x8] sm:$0xff] %v152_v22 }

// kernel: tile.28
= control target key start
LH: loop header
LB: loop body
LE: loop exit
PB: predicated region body
PF: predicated region fallthrough
CT: control target
= control target key end

     0   :  { %s22_s0 = inlined_call_operand.vmem [shape: f32[3], index: 0, kind: input, shape index: {}]   ;;  %s23_s1 = inlined_call_operand.vmem [shape: f32[4,3], index: 1, kind: output, shape index: {}]  }
   0x1   :  { %v4_v0 = vld [vmem:[%s22_s0] ss:$0 sm:$0xff] }
   0x2   :  { %5 = vst [vmem:[%s23_s1] sm:$0xf] %v4_v0 }

// kernel: tile.29
= control target key start
LH: loop header
LB: loop body
LE: loop exit
PB: predicated region body
PF: predicated region fallthrough
CT: control target
= control target key end

     0   :  { %vm7_vm0 = vcmask 23552   ;;  %s37_s8 = smov 3   ;;  %s38_s9 = smov 6   ;;  %vm13_vm1 = vcmask 97352   ;;  %vm19_vm2 = vcmask 72752   ;;  %vm25_vm3 = vcmask 48152   ;;  %s55_s0 = inlined_call_operand.vmem [shape: f32[4,3], index: 0, kind: input, shape index: {}]   ;;  %s56_s1 = inlined_call_operand.vmem [shape: f32[1,12], index: 1, kind: output, shape index: {}]  }
   0x1   :  { %v4_v0 = vld [vmem:[%s55_s0] sm:$0xf]  ;;  %s36_s0 = smov 9  }
   0x2   :  { %5 = vst [vmem:[#allocation1] sm:$0xf] %v4_v0 }
   0x9   :  { %v10_v1 = vld [vmem:[#allocation1 + $0x3] sm:$0x1]   ;;  %v22_v2 = vld [vmem:[#allocation1 + $0x1] sm:$0x1]   ;;  %v6_v3 = vld [vmem:[#allocation1] sm:$0x1]  }
   0xa   :  { %11 = vrot.lane.b32.xlu0 %v10_v1, %s36_s0  ;;  %23 = vrot.lane.b32.xlu1 %v22_v2, %s37_s8  ;;  %v16_v4 = vld [vmem:[#allocation1 + $0x2] sm:$0x1]   ;;  %8 = vst.msk [vmem:[#allocation0] sm:$0x1] %vm7_vm0, %v6_v3  }
   0xe   :  { %17 = vrot.lane.b32.xlu0 %v16_v4, %s38_s9 }
  0x7c   :  { %v12_v5 = vpop.permute.xlu0 %11   ;;  %v24_v6 = vpop.permute.xlu1 %23  }
  0x7d   :  { %14 = vst.msk [vmem:[#allocation0] sm:$0x1] %vm13_vm1, %v12_v5  }
  0x80   :  { %v18_v7 = vpop.permute.xlu0 %17  }
  0x81   :  { %20 = vst.msk [vmem:[#allocation0] sm:$0x1] %vm19_vm2, %v18_v7  }
  0x82   :  { %26 = vst.msk [vmem:[#allocation0] sm:$0x1] %vm25_vm3, %v24_v6  }
  0x89   :  { %v30_v8 = vld [vmem:[#allocation0] sm:$0x1] }
  0x8a   :  { %32 = vst [vmem:[%s56_s1] sm:$0x1] %v30_v8 }

// kernel: conv_autoencoder_forward.11
= control target key start
LH: loop header
LB: loop body
LE: loop exit
PB: predicated region body
PF: predicated region fallthrough
CT: control target
= control target key end

     0   :  { %vm110_vm0 = vcmask 523264   ;;  %s638_s1 = inlined_call_operand.vmem [shape: bf16[64,128], index: 1, kind: input, shape index: {}]   ;;  %s639_s0 = inlined_call_operand.vmem [shape: bf16[128,64], index: 0, kind: input, shape index: {}]   ;;  %s640_s2 = inlined_call_operand.vmem [shape: f32[1,128], index: 2, kind: input, shape index: {}]   ;;  %s641_s3 = inlined_call_operand.vmem [shape: f32[128,128], index: 3, kind: output, shape index: {}]  }
   0x1   :  { %v429_v0 = vld [vmem:[%s638_s1] sm:$0xff]   ;;  %v430_v1 = vld [vmem:[%s638_s1 + $0x8] sm:$0xff]   ;;  %v431_v2 = vld [vmem:[%s638_s1 + $0x10] sm:$0xff]  }
   0x2   :  { %397 = vmatprep.subr.bf16.mxu0 %v429_v0  ;;  %421 = vmatprep.subr.bf16.mxu1 %v429_v0  ;;  %v433_v3 = vld [vmem:[%s639_s0] sm:$0xff]   ;;  %v432_v5 = vld [vmem:[%s638_s1 + $0x18] sm:$0xff]   ;;  %v435_v6 = vld [vmem:[%s639_s0 + $0x8] sm:$0xff]  }
   0x3   :  { %398 = vmatpush3.bf16.msra.mxu0 %v429_v0  ;;  %425 = vmatpush3.bf16.msra.mxu1 %v429_v0  ;;  %v434_v4 = vld [vmem:[%s639_s0 + $0x20] sm:$0xff]   ;;  %v436_v7 = vld [vmem:[%s639_s0 + $0x28] sm:$0xff]   ;;  %v437_v8 = vld [vmem:[%s639_s0 + $0x10] sm:$0xff]  }
   0x4   :  { %399 = vmatprep.subr.bf16.mxu0 %v430_v1  ;;  %422 = vmatprep.subr.bf16.mxu1 %v430_v1  ;;  %v438_v9 = vld [vmem:[%s639_s0 + $0x30] sm:$0xff]   ;;  %v439_v10 = vld [vmem:[%s639_s0 + $0x18] sm:$0xff]   ;;  %v572_v12 = vld [vmem:[%s640_s2] ss:$0 sm:$0xff] }
   0x5   :  { %405 = vmatprep.mubr.msk.bf16.mxu0 %vm110_vm0, %v433_v3  ;;  %413 = vmatprep.mubr.msk.bf16.mxu1 %vm110_vm0, %v434_v4  ;;  %v440_v11 = vld [vmem:[%s639_s0 + $0x38] sm:$0xff]  }
   0x7   :  { %400 = vmatpush3.bf16.msra.mxu0 %v430_v1  ;;  %426 = vmatpush3.bf16.msra.mxu1 %v430_v1 }
   0x8   :  { %401 = vmatprep.subr.bf16.mxu0 %v431_v2  ;;  %423 = vmatprep.subr.bf16.mxu1 %v431_v2 }
   0xb   :  { %402 = vmatpush3.bf16.msra.mxu0 %v431_v2  ;;  %427 = vmatpush3.bf16.msra.mxu1 %v431_v2 }
   0xc   :  { %403 = vmatprep.subr.bf16.mxu0 %v432_v5  ;;  %424 = vmatprep.subr.bf16.mxu1 %v432_v5 }
   0xf   :  { %404 = vmatpush3.bf16.msra.mxu0 %v432_v5  ;;  %428 = vmatpush3.bf16.msra.mxu1 %v432_v5 }
  0x12   :  { %406 = vmatmul.mubr.msk.bf16.vlgmr.msra.gmra.mrb[0].mxu0 %vm110_vm0, %v435_v6  ;;  %414 = vmatmul.mubr.msk.bf16.vlgmr.msra.gmra.mrb[0].mxu1 %vm110_vm0, %v436_v7 }
  0x13   :  { %409 = vmatprep.mubr.msk.bf16.mxu0 %vm110_vm0, %v437_v8  ;;  %417 = vmatprep.mubr.msk.bf16.mxu1 %vm110_vm0, %v438_v9 }
  0x1a   :  { %410 = vmatmul.mubr.msk.bf16.gmra.mrb[4].mxu0 %vm110_vm0, %v439_v10  ;;  %418 = vmatmul.mubr.msk.bf16.gmra.mrb[4].mxu1 %vm110_vm0, %v440_v11 }
  0xe5   :  { %v407_v13 = vpop.f32.mrb[0].mxu0  ;;  %v415_v14 = vpop.f32.mrb[0].mxu1 }
  0xe6   :  { %v178_v15 = vadd.f32 %v407_v13, %v572_v12  ;;  %v210_v16 = vadd.f32 %v415_v14, %v572_v12  ;;  %v169_v17 = vpop.f32.mrb[1].mxu0  ;;  %v201_v18 = vpop.f32.mrb[1].mxu1 }
  0xe7   :  { %v170_v19 = vadd.f32 %v572_v12, %v169_v17  ;;  %v202_v20 = vadd.f32 %v572_v12, %v201_v18  ;;  %v408_v21 = vpop.f32.mrb[2].mxu0  ;;  %v416_v22 = vpop.f32.mrb[2].mxu1 }
  0xe8   :  { %v371_v23 = vmul.f32 -1.442695, %v178_v15  ;;  %v379_v24 = vmul.f32 -1.442695, %v210_v16  ;;  %v181_v25 = vadd.f32 %v408_v21, %v572_v12  ;;  %v213_v26 = vadd.f32 %v416_v22, %v572_v12  ;;  %v172_v27 = vpop.f32.mrb[3].mxu0  ;;  %v204_v28 = vpop.f32.mrb[3].mxu1 }
  0xe9   :  { %v369_v29 = vmul.f32 -1.442695, %v170_v19  ;;  %v377_v30 = vmul.f32 -1.442695, %v202_v20  ;;  %v173_v31 = vadd.f32 %v572_v12, %v172_v27  ;;  %v205_v32 = vadd.f32 %v572_v12, %v204_v28 }
  0xea   :  { %441 = vpow2.f32 %v371_v23  ;;  %v372_v33 = vmul.f32 -1.442695, %v181_v25  ;;  %v380_v34 = vmul.f32 -1.442695, %v213_v26 }
  0xeb   :  { %443 = vpow2.f32 %v379_v24  ;;  %v370_v35 = vmul.f32 -1.442695, %v173_v31  ;;  %v378_v36 = vmul.f32 -1.442695, %v205_v32 }
  0xec   :  { %445 = vpow2.f32 %v369_v29 }
  0xed   :  { %447 = vpow2.f32 %v377_v30  ;;  %v411_v37 = vpop.f32.mrb[4].mxu0  ;;  %v419_v38 = vpop.f32.mrb[4].mxu1 }
  0xee   :  { %449 = vpow2.f32 %v372_v33  ;;  %v194_v39 = vadd.f32 %v411_v37, %v572_v12  ;;  %v226_v40 = vadd.f32 %v419_v38, %v572_v12  ;;  %v185_v41 = vpop.f32.mrb[5].mxu0  ;;  %v217_v42 = vpop.f32.mrb[5].mxu1 }
  0xef   :  { %451 = vpow2.f32 %v380_v34  ;;  %v186_v43 = vadd.f32 %v572_v12, %v185_v41  ;;  %v218_v44 = vadd.f32 %v572_v12, %v217_v42  ;;  %v412_v45 = vpop.f32.mrb[6].mxu0  ;;  %v420_v46 = vpop.f32.mrb[6].mxu1 }
  0xf0   :  { %453 = vpow2.f32 %v370_v35  ;;  %v375_v47 = vmul.f32 -1.442695, %v194_v39  ;;  %v383_v48 = vmul.f32 -1.442695, %v226_v40  ;;  %v197_v49 = vadd.f32 %v412_v45, %v572_v12  ;;  %v188_v50 = vpop.f32.mrb[7].mxu0  ;;  %v220_v51 = vpop.f32.mrb[7].mxu1 }
  0xf1   :  { %455 = vpow2.f32 %v378_v36  ;;  %v373_v52 = vmul.f32 -1.442695, %v186_v43  ;;  %v381_v53 = vmul.f32 -1.442695, %v218_v44  ;;  %v229_v8 = vadd.f32 %v420_v46, %v572_v12 }
  0xf2   :  { %457 = vpow2.f32 %v375_v47  ;;  %v376_v54 = vmul.f32 -1.442695, %v197_v49  ;;  %v189_v11 = vadd.f32 %v572_v12, %v188_v50  ;;  %v221_v15 = vadd.f32 %v572_v12, %v220_v51 }
  0xf3   :  { %459 = vpow2.f32 %v383_v48  ;;  %v384_v20 = vmul.f32 -1.442695, %v229_v8 }
  0xf4   :  { %v442_v55 = vpop.eup %441  ;;  %461 = vpow2.f32 %v373_v52  ;;  %v374_v23 = vmul.f32 -1.442695, %v189_v11  ;;  %v382_v25 = vmul.f32 -1.442695, %v221_v15 }
  0xf5   :  { %v444_v56 = vpop.eup %443  ;;  %v282_v57 = vadd.f32 1.0, %v442_v55  ;;  %463 = vpow2.f32 %v381_v53 }
  0xf6   :  { %v446_v58 = vpop.eup %445  ;;  %v290_v59 = vadd.f32 1.0, %v444_v56  ;;  %465 = vpow2.f32 %v376_v54 }
  0xf7   :  { %v448_v60 = vpop.eup %447  ;;  %467 = vrcp.f32 %v282_v57  ;;  %v280_v61 = vadd.f32 1.0, %v446_v58 }
  0xf8   :  { %v450_v62 = vpop.eup %449  ;;  %469 = vrcp.f32 %v290_v59  ;;  %v288_v63 = vadd.f32 1.0, %v448_v60 }
  0xf9   :  { %v452_v0 = vpop.eup %451  ;;  %471 = vrcp.f32 %v280_v61  ;;  %v283_v1 = vadd.f32 1.0, %v450_v62 }
  0xfa   :  { %v454_v2 = vpop.eup %453  ;;  %473 = vrcp.f32 %v288_v63  ;;  %v291_v3 = vadd.f32 1.0, %v452_v0 }
  0xfb   :  { %v456_v4 = vpop.eup %455  ;;  %475 = vrcp.f32 %v283_v1  ;;  %v281_v5 = vadd.f32 1.0, %v454_v2 }
  0xfc   :  { %v458_v6 = vpop.eup %457  ;;  %477 = vrcp.f32 %v291_v3  ;;  %v289_v7 = vadd.f32 1.0, %v456_v4 }
  0xfd   :  { %v460_v9 = vpop.eup %459  ;;  %479 = vrcp.f32 %v281_v5  ;;  %v286_v10 = vadd.f32 1.0, %v458_v6 }
  0xfe   :  { %v462_v13 = vpop.eup %461  ;;  %481 = vrcp.f32 %v289_v7  ;;  %v294_v14 = vadd.f32 1.0, %v460_v9 }
  0xff   :  { %v464_v16 = vpop.eup %463  ;;  %483 = vrcp.f32 %v286_v10  ;;  %v284_v17 = vadd.f32 1.0, %v462_v13 }
 0x100   :  { %v466_v18 = vpop.eup %465  ;;  %485 = vrcp.f32 %v294_v14  ;;  %v292_v19 = vadd.f32 1.0, %v464_v16 }
 0x101   :  { %v468_v21 = vpop.eup %467  ;;  %487 = vrcp.f32 %v284_v17  ;;  %v287_v22 = vadd.f32 1.0, %v466_v18 }
 0x102   :  { %v470_v24 = vpop.eup %469  ;;  %330 = vst [vmem:[%s641_s3 + $0x10] sm:$0xff] %v468_v21  ;;  %489 = vrcp.f32 %v292_v19 }
 0x103   :  { %v472_v26 = vpop.eup %471  ;;  %338 = vst [vmem:[%s641_s3 + $0x50] sm:$0xff] %v470_v24  ;;  %491 = vrcp.f32 %v287_v22 }
 0x104   :  { %v474_v12 = vpop.eup %473  ;;  %328 = vst [vmem:[%s641_s3] sm:$0xff] %v472_v26  ;;  %493 = vpow2.f32 %v384_v20 }
 0x105   :  { %v476_v27 = vpop.eup %475  ;;  %336 = vst [vmem:[%s641_s3 + $0x40] sm:$0xff] %v474_v12  ;;  %495 = vpow2.f32 %v374_v23 }
 0x106   :  { %v478_v28 = vpop.eup %477  ;;  %331 = vst [vmem:[%s641_s3 + $0x18] sm:$0xff] %v476_v27  ;;  %497 = vpow2.f32 %v382_v25 }
 0x107   :  { %v480_v29 = vpop.eup %479  ;;  %339 = vst [vmem:[%s641_s3 + $0x58] sm:$0xff] %v478_v28 }
 0x108   :  { %v482_v30 = vpop.eup %481  ;;  %329 = vst [vmem:[%s641_s3 + $0x8] sm:$0xff] %v480_v29 }
 0x109   :  { %v484_v31 = vpop.eup %483  ;;  %337 = vst [vmem:[%s641_s3 + $0x48] sm:$0xff] %v482_v30 }
 0x10a   :  { %v486_v32 = vpop.eup %485  ;;  %334 = vst [vmem:[%s641_s3 + $0x30] sm:$0xff] %v484_v31 }
 0x10b   :  { %v488_v33 = vpop.eup %487  ;;  %342 = vst [vmem:[%s641_s3 + $0x70] sm:$0xff] %v486_v32 }
 0x10c   :  { %v490_v34 = vpop.eup %489  ;;  %332 = vst [vmem:[%s641_s3 + $0x20] sm:$0xff] %v488_v33 }
 0x10d   :  { %v492_v35 = vpop.eup %491  ;;  %340 = vst [vmem:[%s641_s3 + $0x60] sm:$0xff] %v490_v34 }
 0x10e   :  { %v494_v36 = vpop.eup %493  ;;  %335 = vst [vmem:[%s641_s3 + $0x38] sm:$0xff] %v492_v35 }
 0x10f   :  { %v496_v37 = vpop.eup %495  ;;  %v295_v38 = vadd.f32 1.0, %v494_v36 }
 0x110   :  { %v498_v39 = vpop.eup %497  ;;  %v285_v40 = vadd.f32 1.0, %v496_v37 }
 0x111   :  { %499 = vrcp.f32 %v295_v38  ;;  %v293_v41 = vadd.f32 1.0, %v498_v39 }
 0x112   :  { %501 = vrcp.f32 %v285_v40 }
 0x113   :  { %503 = vrcp.f32 %v293_v41 }
 0x11b   :  { %v500_v42 = vpop.eup %499 }
 0x11c   :  { %v502_v43 = vpop.eup %501  ;;  %343 = vst [vmem:[%s641_s3 + $0x78] sm:$0xff] %v500_v42 }
 0x11d   :  { %v504_v44 = vpop.eup %503  ;;  %333 = vst [vmem:[%s641_s3 + $0x28] sm:$0xff] %v502_v43 }
 0x11e   :  { %341 = vst [vmem:[%s641_s3 + $0x68] sm:$0xff] %v504_v44 }

</bundles_post_ra>
